<compile_context>
chip_gen: v5e
topology: v5e:2x2
jax: 0.10.0
libtpu: 0.0.40
codegen_flags: <defaults>
</compile_context>

<pallas_src>
import functools

import jax
import jax.numpy as jnp
from jax.experimental import pallas as pl
from jax.experimental.pallas import tpu as pltpu

LANE = 128        # vreg lane width: pad feature dims to this
SUBLANE = 8       # vreg sublane count: batch tiles must be a multiple of this
MAX_ROW_TILE = 512


def _round_up(n, m):
    return ((n + m - 1) // m) * m


# ------------------------------------------------------------------------------ kernel
def _fused_odenet_kernel(t_ref, x_ref, wx_ref, wtb_ref, o_ref, *, n_layers):
    """All layers fused; activations never leave vregs/VMEM.

    t_ref   : (1,)        SMEM  scalar time
    x_ref   : (tile, F)   VMEM  input row tile (f32), pipelined over the batch grid
    wx_ref  : (L, F, F)   VMEM  stacked x-weights (grid-invariant, single copy)
    wtb_ref : (L, 2, F)   VMEM  row 0 = time-channel weight, row 1 = bias (f32)
    o_ref   : (tile, F)   VMEM  output row tile
    """
    t = t_ref[0]
    h = x_ref[...]                               # f32 activations
    mm_dtype = wx_ref.dtype                      # f32 (or bf16 if requested)
    for i in range(n_layers):                    # static unroll: layer count is fixed
        tb = t * wtb_ref[i, 0:1, :] + wtb_ref[i, 1:2, :]        # (1, F), f32
        h = jnp.dot(h.astype(mm_dtype), wx_ref[i],
                    preferred_element_type=jnp.float32) + tb
        if i < n_layers - 1:
            # explicit numerically-stable softplus: exp/log1p sit in the free EUP
            # slot; avoids logaddexp's extra inf/nan-guard selects on the VALU.
            h = jnp.maximum(h, 0.0) + jnp.log1p(jnp.exp(-jnp.abs(h)))
    o_ref[...] = h.astype(o_ref.dtype)


# ------------------------------------------------------------------------------ params
def init_odenet_params(key, in_dim, hidden_dims, out_dim):
    """Deterministic init mimicking nn.Linear(dim_in+1, dim_out) uniform init."""
    hidden_dims = [hidden_dims] if isinstance(hidden_dims, int) else list(hidden_dims)
    dims = [in_dim] + hidden_dims + [out_dim]
    params = []
    for i in range(len(dims) - 1):
        fan_in = dims[i] + 1  # ConcatLinear: +1 is the concatenated time channel
        bound = 1.0 / (fan_in ** 0.5)
        key, k_w, k_b = jax.random.split(key, 3)
        w = jax.random.uniform(
            k_w, (dims[i + 1], fan_in), minval=-bound, maxval=bound, dtype=jnp.float32
        )
        bias = jax.random.uniform(
            k_b, (dims[i + 1],), minval=-bound, maxval=bound, dtype=jnp.float32
        )
        wt = w[:, 0:1].T          # (1, d_out)
        wx = w[:, 1:].T           # (d_in, d_out)
        params.append((wx, wt, bias.reshape(1, -1)))
    return params


def stack_params_for_tpu(params, matmul_dtype=jnp.float32):
    """Zero-pad every layer to one common 128-lane feature width F and stack into
    two arrays.  Padding is mathematically inert: padded wx rows/cols and wt/b
    columns are zero, so spurious softplus(0) values in padded lanes always
    multiply zero weight rows in the next layer."""
    dins = [wx.shape[0] for wx, _, _ in params]
    douts = [wx.shape[1] for wx, _, _ in params]
    F = _round_up(max(dins + douts), LANE)
    L = len(params)
    wx_s = jnp.zeros((L, F, F), matmul_dtype)
    wtb_s = jnp.zeros((L, 2, F), jnp.float32)
    for i, (wx, wt, b) in enumerate(params):
        din, dout = wx.shape
        wx_s = wx_s.at[i, :din, :dout].set(wx.astype(matmul_dtype))
        wtb_s = wtb_s.at[i, 0, :dout].set(wt[0])
        wtb_s = wtb_s.at[i, 1, :dout].set(b[0])
    return wx_s, wtb_s


# ------------------------------------------------------------------------------ wrapper
def odenet_forward(t, x, wx_stack, wtb_stack, out_dim):
    """Fused Pallas implementation of ODEnet.forward(t, x)."""
    B, in_dim = x.shape
    n_layers, F, _ = wx_stack.shape

    # Adaptive row tiling: split round_up(B, 8) into near-equal sublane-aligned
    # tiles capped at MAX_ROW_TILE -> batch padding is always < one sublane group
    # per tile (never a near-full wasted tile).
    B_8 = _round_up(max(B, 1), SUBLANE)
    n_tiles = pl.cdiv(B_8, MAX_ROW_TILE)
    tile_rows = _round_up(pl.cdiv(B_8, n_tiles), SUBLANE)
    B_pad = tile_rows * n_tiles

    x_p = jnp.zeros((B_pad, F), jnp.float32).at[:B, :in_dim].set(x.astype(jnp.float32))
    t_arr = jnp.asarray(t, dtype=jnp.float32).reshape((1,))

    in_specs = [
        pl.BlockSpec(memory_space=pltpu.MemorySpace.SMEM),    # t scalar
        pl.BlockSpec((tile_rows, F), lambda i: (i, 0)),       # x row tile (pipelined)
        # Grid-invariant weights: whole arrays resident in VMEM, one DMA each,
        # single copy (no double-buffering) -> half the weight VMEM footprint.
        pl.BlockSpec(memory_space=pltpu.MemorySpace.VMEM),    # wx_stack (L, F, F)
        pl.BlockSpec(memory_space=pltpu.MemorySpace.VMEM),    # wtb_stack (L, 2, F)
    ]

    # VMEM budget: weights (single copy) + double-buffered in/out tiles + live h.
    elt = jnp.dtype(wx_stack.dtype).itemsize
    weight_bytes = n_layers * F * F * elt + n_layers * 8 * F * 4
    act_bytes = 5 * tile_rows * F * 4
    vmem_needed = weight_bytes + act_bytes
    vmem_limit = None
    if vmem_needed > 12 * (1 << 20):   # beyond v5e's scoped-VMEM comfort zone
        vmem_limit = min(int(1.5 * vmem_needed) + (4 << 20), 60 * (1 << 20))

    # Advisory cost estimate so XLA schedules the surrounding ODE-solver ops sanely.
    flops = 2 * B_pad * n_layers * F * F
    transcendentals = 2 * B_pad * F * max(n_layers - 1, 0)
    bytes_accessed = int(wx_stack.nbytes + wtb_stack.nbytes + x_p.nbytes + B_pad * F * 4)

    # TODO(synk): on v7x use dimension_semantics=(pltpu.CORE_PARALLEL,) with >=2 row
    #             tiles so the batch grid is sharded across its 2 TensorCores.
    # TODO(synk): amortize launch + weight DMA across ODE-solver RHS evaluations
    #             (cross-call VMEM residency or a solver-stage grid axis with t
    #             passed via scalar prefetch).
    out_p = pl.pallas_call(
        functools.partial(_fused_odenet_kernel, n_layers=n_layers),
        out_shape=jax.ShapeDtypeStruct((B_pad, F), jnp.float32),
        grid=(n_tiles,),
        in_specs=in_specs,
        out_specs=pl.BlockSpec((tile_rows, F), lambda i: (i, 0)),
        compiler_params=pltpu.CompilerParams(
            dimension_semantics=("parallel",), vmem_limit_bytes=vmem_limit),
        cost_estimate=pl.CostEstimate(
            flops=flops, transcendentals=transcendentals,
            bytes_accessed=bytes_accessed),
    )(t_arr, x_p, wx_stack, wtb_stack)

    return out_p[:B, :out_dim]


def odenet_forward_ref(t, x, params):
    """Pure-JAX reference (mirrors the PyTorch forward) for the correctness check."""
    n_layers = len(params)
    for i, (wx, wt, b) in enumerate(params):
        x = x @ wx + t * wt + b
        if i < n_layers - 1:
            x = jax.nn.softplus(x)
    return x


if __name__ == "__main__":
    key = jax.random.PRNGKey(0)
    key, k_x, k_x2 = jax.random.split(key, 3)

    in_dim, hidden_dims, out_dim = 16, [32, 32], 16
    t = 0.5

    params = init_odenet_params(key, in_dim, hidden_dims, out_dim)
    # f32 matmul operands by default (exact); for MXU-bound sizes on v6e/v7x use
    # stack_params_for_tpu(params, matmul_dtype=jnp.bfloat16) and loosen tolerances.
    wx_stack, wtb_stack = stack_params_for_tpu(params)

    # Small batch: single row tile, grid=(1,)
    x = jax.random.normal(k_x, (8, in_dim), dtype=jnp.float32)
    out = jax.block_until_ready(odenet_forward(t, x, wx_stack, wtb_stack, out_dim))
    ref = odenet_forward_ref(t, x, params)
    assert out.shape == (8, out_dim)
    assert jnp.allclose(out, ref, atol=1e-5, rtol=1e-5)

    # Larger, non-tile-aligned batch: exercises adaptive tiling + multi-step grid.
    x2 = jax.random.normal(k_x2, (600, in_dim), dtype=jnp.float32)
    out2 = jax.block_until_ready(odenet_forward(t, x2, wx_stack, wtb_stack, out_dim))
    ref2 = odenet_forward_ref(t, x2, params)
    assert out2.shape == (600, out_dim)
    assert jnp.allclose(out2, ref2, atol=1e-5, rtol=1e-5)

    print("KERNEL_OK")
</pallas_src>

<mosaic_0001>
module attributes {stable_mosaic.version = 11 : i64} {
  func.func @_fused_odenet_kernel(%arg0: i32, %arg1: memref<1xf32, #tpu.memory_space<smem>>, %arg2: memref<8x128xf32, #tpu.memory_space<vmem>>, %arg3: memref<3x128x128xf32, #tpu.memory_space<vmem>>, %arg4: memref<3x2x128xf32, #tpu.memory_space<vmem>>, %arg5: memref<8x128xf32, #tpu.memory_space<vmem>>) attributes {dimension_semantics = [#tpu.dimension_semantics<parallel>], iteration_bounds = array<i64: 1>, scalar_prefetch = 0 : i64, scratch_operands = 0 : i64, tpu.core_type = #tpu.core_type<tc>, window_params = [{transform_indices = @transform_0, window_bounds = array<i64: 1>}, {transform_indices = @transform_1, window_bounds = array<i64: 8, 128>}, {pipeline_mode = #tpu.pipeline_mode<synchronous>, transform_indices = @transform_2, window_bounds = array<i64: 3, 128, 128>}, {pipeline_mode = #tpu.pipeline_mode<synchronous>, transform_indices = @transform_3, window_bounds = array<i64: 3, 2, 128>}, {transform_indices = @transform_4, window_bounds = array<i64: 8, 128>}]} {
    %c0 = arith.constant 0 : index
    %0 = memref.load %arg1[%c0] : memref<1xf32, #tpu.memory_space<smem>>
    %c0_0 = arith.constant 0 : index
    %c0_1 = arith.constant 0 : index
    %1 = vector.load %arg2[%c0_0, %c0_1] : memref<8x128xf32, #tpu.memory_space<vmem>>, vector<8x128xf32>
    %c0_2 = arith.constant 0 : index
    %c0_3 = arith.constant 0 : index
    %c0_4 = arith.constant 0 : index
    %2 = vector.load %arg4[%c0_2, %c0_3, %c0_4] : memref<3x2x128xf32, #tpu.memory_space<vmem>>, vector<1x1x128xf32>
    %3 = vector.shape_cast %2 : vector<1x1x128xf32> to vector<1x128xf32>
    %4 = vector.broadcast %0 : f32 to vector<1x128xf32>
    %5 = arith.mulf %4, %3 : vector<1x128xf32>
    %c0_5 = arith.constant 0 : index
    %c1 = arith.constant 1 : index
    %c0_6 = arith.constant 0 : index
    %6 = vector.load %arg4[%c0_5, %c1, %c0_6] : memref<3x2x128xf32, #tpu.memory_space<vmem>>, vector<1x1x128xf32>
    %7 = vector.shape_cast %6 : vector<1x1x128xf32> to vector<1x128xf32>
    %8 = arith.addf %5, %7 : vector<1x128xf32>
    %c0_7 = arith.constant 0 : index
    %c0_8 = arith.constant 0 : index
    %c0_9 = arith.constant 0 : index
    %9 = vector.load %arg3[%c0_7, %c0_8, %c0_9] : memref<3x128x128xf32, #tpu.memory_space<vmem>>, vector<1x128x128xf32>
    %10 = vector.shape_cast %9 : vector<1x128x128xf32> to vector<128x128xf32>
    %cst = arith.constant dense<0.000000e+00> : vector<8x128xf32>
    %11 = tpu.matmul %1, %10, %cst {dimension_numbers = #tpu.dot_dimension_numbers<[1], [0], [0], [1], [0, 0, 1, 1], [], []>} : vector<8x128xf32>, vector<128x128xf32>, vector<8x128xf32> -> vector<8x128xf32>
    %12 = vector.broadcast %8 : vector<1x128xf32> to vector<8x128xf32>
    %13 = arith.addf %11, %12 : vector<8x128xf32>
    %cst_10 = arith.constant 0.000000e+00 : f32
    %14 = vector.broadcast %cst_10 : f32 to vector<8x128xf32>
    %15 = arith.maximumf %13, %14 : vector<8x128xf32>
    %16 = math.absf %13 : vector<8x128xf32>
    %cst_11 = arith.constant 0.000000e+00 : f32
    %17 = vector.broadcast %cst_11 : f32 to vector<8x128xf32>
    %18 = arith.subf %17, %16 : vector<8x128xf32>
    %19 = math.exp %18 : vector<8x128xf32>
    %20 = math.log1p %19 : vector<8x128xf32>
    %21 = arith.addf %15, %20 : vector<8x128xf32>
    %c1_12 = arith.constant 1 : index
    %c0_13 = arith.constant 0 : index
    %c0_14 = arith.constant 0 : index
    %22 = vector.load %arg4[%c1_12, %c0_13, %c0_14] : memref<3x2x128xf32, #tpu.memory_space<vmem>>, vector<1x1x128xf32>
    %23 = vector.shape_cast %22 : vector<1x1x128xf32> to vector<1x128xf32>
    %24 = vector.broadcast %0 : f32 to vector<1x128xf32>
    %25 = arith.mulf %24, %23 : vector<1x128xf32>
    %c1_15 = arith.constant 1 : index
    %c1_16 = arith.constant 1 : index
    %c0_17 = arith.constant 0 : index
    %26 = vector.load %arg4[%c1_15, %c1_16, %c0_17] : memref<3x2x128xf32, #tpu.memory_space<vmem>>, vector<1x1x128xf32>
    %27 = vector.shape_cast %26 : vector<1x1x128xf32> to vector<1x128xf32>
    %28 = arith.addf %25, %27 : vector<1x128xf32>
    %c1_18 = arith.constant 1 : index
    %c0_19 = arith.constant 0 : index
    %c0_20 = arith.constant 0 : index
    %29 = vector.load %arg3[%c1_18, %c0_19, %c0_20] : memref<3x128x128xf32, #tpu.memory_space<vmem>>, vector<1x128x128xf32>
    %30 = vector.shape_cast %29 : vector<1x128x128xf32> to vector<128x128xf32>
    %cst_21 = arith.constant dense<0.000000e+00> : vector<8x128xf32>
    %31 = tpu.matmul %21, %30, %cst_21 {dimension_numbers = #tpu.dot_dimension_numbers<[1], [0], [0], [1], [0, 0, 1, 1], [], []>} : vector<8x128xf32>, vector<128x128xf32>, vector<8x128xf32> -> vector<8x128xf32>
    %32 = vector.broadcast %28 : vector<1x128xf32> to vector<8x128xf32>
    %33 = arith.addf %31, %32 : vector<8x128xf32>
    %cst_22 = arith.constant 0.000000e+00 : f32
    %34 = vector.broadcast %cst_22 : f32 to vector<8x128xf32>
    %35 = arith.maximumf %33, %34 : vector<8x128xf32>
    %36 = math.absf %33 : vector<8x128xf32>
    %cst_23 = arith.constant 0.000000e+00 : f32
    %37 = vector.broadcast %cst_23 : f32 to vector<8x128xf32>
    %38 = arith.subf %37, %36 : vector<8x128xf32>
    %39 = math.exp %38 : vector<8x128xf32>
    %40 = math.log1p %39 : vector<8x128xf32>
    %41 = arith.addf %35, %40 : vector<8x128xf32>
    %c2 = arith.constant 2 : index
    %c0_24 = arith.constant 0 : index
    %c0_25 = arith.constant 0 : index
    %42 = vector.load %arg4[%c2, %c0_24, %c0_25] : memref<3x2x128xf32, #tpu.memory_space<vmem>>, vector<1x1x128xf32>
    %43 = vector.shape_cast %42 : vector<1x1x128xf32> to vector<1x128xf32>
    %44 = vector.broadcast %0 : f32 to vector<1x128xf32>
    %45 = arith.mulf %44, %43 : vector<1x128xf32>
    %c2_26 = arith.constant 2 : index
    %c1_27 = arith.constant 1 : index
    %c0_28 = arith.constant 0 : index
    %46 = vector.load %arg4[%c2_26, %c1_27, %c0_28] : memref<3x2x128xf32, #tpu.memory_space<vmem>>, vector<1x1x128xf32>
    %47 = vector.shape_cast %46 : vector<1x1x128xf32> to vector<1x128xf32>
    %48 = arith.addf %45, %47 : vector<1x128xf32>
    %c2_29 = arith.constant 2 : index
    %c0_30 = arith.constant 0 : index
    %c0_31 = arith.constant 0 : index
    %49 = vector.load %arg3[%c2_29, %c0_30, %c0_31] : memref<3x128x128xf32, #tpu.memory_space<vmem>>, vector<1x128x128xf32>
    %50 = vector.shape_cast %49 : vector<1x128x128xf32> to vector<128x128xf32>
    %cst_32 = arith.constant dense<0.000000e+00> : vector<8x128xf32>
    %51 = tpu.matmul %41, %50, %cst_32 {dimension_numbers = #tpu.dot_dimension_numbers<[1], [0], [0], [1], [0, 0, 1, 1], [], []>} : vector<8x128xf32>, vector<128x128xf32>, vector<8x128xf32> -> vector<8x128xf32>
    %52 = vector.broadcast %48 : vector<1x128xf32> to vector<8x128xf32>
    %53 = arith.addf %51, %52 : vector<8x128xf32>
    %c0_33 = arith.constant 0 : index
    %c0_34 = arith.constant 0 : index
    %54 = vector.load %arg5[%c0_33, %c0_34] : memref<8x128xf32, #tpu.memory_space<vmem>>, vector<8x128xf32>
    tpu.vector_store %arg5[%c0_33, %c0_34], %53 {strides = array<i32>} : memref<8x128xf32, #tpu.memory_space<vmem>>, vector<8x128xf32>,
    return
  }
  func.func @transform_0(%arg0: i32) -> i32 {
    %c0_i32 = arith.constant 0 : i32
    %c0_i32_0 = arith.constant 0 : i32
    return %c0_i32 : i32
  }
  func.func @transform_1(%arg0: i32) -> (i32, i32) {
    %c0_i32 = arith.constant 0 : i32
    %c0_i32_0 = arith.constant 0 : i32
    return %arg0, %c0_i32 : i32, i32
  }
  func.func @transform_2(%arg0: i32) -> (i32, i32, i32) {
    %c0_i32 = arith.constant 0 : i32
    %c0_i32_0 = arith.constant 0 : i32
    %c0_i32_1 = arith.constant 0 : i32
    %c0_i32_2 = arith.constant 0 : i32
    return %c0_i32, %c0_i32_0, %c0_i32_1 : i32, i32, i32
  }
  func.func @transform_3(%arg0: i32) -> (i32, i32, i32) {
    %c0_i32 = arith.constant 0 : i32
    %c0_i32_0 = arith.constant 0 : i32
    %c0_i32_1 = arith.constant 0 : i32
    %c0_i32_2 = arith.constant 0 : i32
    return %c0_i32, %c0_i32_0, %c0_i32_1 : i32, i32, i32
  }
  func.func @transform_4(%arg0: i32) -> (i32, i32) {
    %c0_i32 = arith.constant 0 : i32
    %c0_i32_0 = arith.constant 0 : i32
    return %arg0, %c0_i32 : i32, i32
  }
}

</mosaic_0001>

<bundles_post_ra>
// kernel: tpu_custom_call.1
= control target key start
LH: loop header
LB: loop body
LE: loop exit
PB: predicated region body
PF: predicated region fallthrough
CT: control target
= control target key end

     0   :  { %10 = vsyncpa [#allocation4], 0  ;;  %s414_s0 = inlined_call_operand.<no memory space> [shape: f32[1], index: 0, kind: input, shape index: {}]   ;;  %s415_s1 = inlined_call_operand.hbm [shape: f32[8,128], index: 1, kind: input, shape index: {}]   ;;  %s416_s2 = inlined_call_operand.hbm [shape: f32[3,128,128], index: 2, kind: input, shape index: {}]   ;;  %s417_s3 = inlined_call_operand.hbm [shape: f32[3,2,128], index: 3, kind: input, shape index: {}]   ;;  %s418_s4 = inlined_call_operand.hbm [shape: f32[8,128], index: 4, kind: output, shape index: {}]  }
   0x1   :  { %11 = vsyncpa [#allocation7], 0  ;;  %s30_s17 = sshll.u32 %s416_s2, 4  ;;  %s31_s17 = int_to_ptr.hbm [resolvable:$true] %s30_s17 }
   0x2   :  { %12 = vsyncpa [#allocation5], 0  ;;  %s361_s18 = smov [#allocation6]   ;;  %s20_s22 = sshll.u32 %s415_s1, 4  ;;  %s21_s22 = int_to_ptr.hbm [resolvable:$true] %s20_s22 }
   0x3   :  { %s32_s19 = sshll.u32 %s361_s18, 4  ;;  %s362_s23 = smov 128   ;;  %s33_s19 = int_to_ptr.vmem [resolvable:$true] %s32_s19 }
   0x4   :  { %s363_s24 = smov 8   ;;  %s364_s25 = smov [#allocation3]  }
   0x5   :  { %38 = dma.hbm_to_vmem [thread:$0]  %s31_s17, 6144, %s33_s19, [#allocation7], %s362_s23, %s362_s23, %s363_s24  }
   0x6   :  { %s22_s26 = sshll.u32 %s364_s25, 4  ;;  %s43_s29 = sshll.u32 %s417_s3, 4  ;;  %s23_s26 = int_to_ptr.vmem [resolvable:$true] %s22_s26  ;;  %s44_s29 = int_to_ptr.hbm [resolvable:$true] %s43_s29 }
   0x7   :  { %25 = dma.hbm_to_vmem [thread:$0]  %s21_s22, 128, %s23_s26, [#allocation4]  }
   0x8   :  { %s365_s2 = smov [#allocation8]   ;;  %s366_s5 = smov 32  }
   0x9   :  { %s45_s30 = sshll.u32 %s365_s2, 4  ;;  %s367_s6 = smov 2   ;;  %s46_s30 = int_to_ptr.vmem [resolvable:$true] %s45_s30 }
   0xa   :  { %51 = dma.hbm_to_vmem [thread:$0]  %s44_s29, 96, %s46_s30, [#allocation7], %s366_s5, %s366_s5, %s367_s6  }
   0xb   :  { %355 = dma.done.wait [#allocation4], 128  }
   0xc   :  { %356 = vsyncadd [#allocation4], 4294967168 }
   0xd   :  { %357 = dma.done.wait [#allocation7], 6240  }
   0xe   :  { %358 = vsyncadd [#allocation7], 4294961056  ;;  %v86_v0 = vld [vmem:[#allocation6 + $0x78] sm:$0xff]  ;;  %v85_v1 = vld [vmem:[#allocation6 + $0x70] sm:$0xff]  ;;  %v406_v29 = vstv %s414_s0  ;;  %s368_s0 = smov [#allocation9]   ;;  %s232_s10 = sshll.u32 %s418_s4, 4  ;;  %s233_s10 = int_to_ptr.hbm [resolvable:$true] %s232_s10 }
   0xf   :  { %88 = vmatpush.msra.mxu0 %v86_v0  ;;  %v84_v2 = vld [vmem:[#allocation6 + $0x68] sm:$0xff]  ;;  %v83_v3 = vld [vmem:[#allocation6 + $0x60] sm:$0xff]  ;;  %v144_v4 = vld [vmem:[#allocation6 + $0xf8] sm:$0xff]  ;;  %s230_s7 = sshll.u32 %s368_s0, 4  ;;  %s231_s7 = int_to_ptr.vmem [resolvable:$true] %s230_s7 }
  0x10   :  { %v82_v5 = vld [vmem:[#allocation6 + $0x58] sm:$0xff]  ;;  %146 = vmatpush.msra.mxu1 %v144_v4  ;;  %v81_v6 = vld [vmem:[#allocation6 + $0x50] sm:$0xff]  ;;  %v80_v7 = vld [vmem:[#allocation6 + $0x48] sm:$0xff] }
  0x11   :  { %89 = vmatpush.msra.mxu0 %v85_v1  ;;  %v79_v8 = vld [vmem:[#allocation6 + $0x40] sm:$0xff]  ;;  %v78_v9 = vld [vmem:[#allocation6 + $0x38] sm:$0xff]  ;;  %v77_v10 = vld [vmem:[#allocation6 + $0x30] sm:$0xff] }
  0x12   :  { %v76_v11 = vld [vmem:[#allocation6 + $0x28] sm:$0xff]  ;;  %v75_v12 = vld [vmem:[#allocation6 + $0x20] sm:$0xff]  ;;  %v74_v13 = vld [vmem:[#allocation6 + $0x18] sm:$0xff] }
  0x13   :  { %90 = vmatpush.msra.mxu0 %v84_v2  ;;  %v73_v14 = vld [vmem:[#allocation6 + $0x10] sm:$0xff]  ;;  %v72_v15 = vld [vmem:[#allocation6 + $0x8] sm:$0xff]  ;;  %v71_v16 = vld [vmem:[#allocation6] sm:$0xff] }
  0x14   :  { %v65_v17 = vld [vmem:[#allocation3] sm:$0xff]  ;;  %v143_v18 = vld [vmem:[#allocation6 + $0xf0] sm:$0xff]  ;;  %v142_v19 = vld [vmem:[#allocation6 + $0xe8] sm:$0xff] }
  0x15   :  { %91 = vmatpush.msra.mxu0 %v83_v3  ;;  %147 = vmatpush.msra.mxu1 %v143_v18  ;;  %v141_v20 = vld [vmem:[#allocation6 + $0xe0] sm:$0xff]  ;;  %v140_v21 = vld [vmem:[#allocation6 + $0xd8] sm:$0xff]  ;;  %v139_v22 = vld [vmem:[#allocation6 + $0xd0] sm:$0xff] }
  0x16   :  { %v138_v23 = vld [vmem:[#allocation6 + $0xc8] sm:$0xff]  ;;  %v137_v24 = vld [vmem:[#allocation6 + $0xc0] sm:$0xff]  ;;  %v136_v25 = vld [vmem:[#allocation6 + $0xb8] sm:$0xff] }
  0x17   :  { %92 = vmatpush.msra.mxu0 %v82_v5  ;;  %148 = vmatpush.msra.mxu1 %v142_v19  ;;  %v135_v26 = vld [vmem:[#allocation6 + $0xb0] sm:$0xff]  ;;  %v134_v27 = vld [vmem:[#allocation6 + $0xa8] sm:$0xff]  ;;  %v66_v28 = vld [vmem:[#allocation8] sm:$0x1] }
  0x18   :  { %v133_v30 = vld [vmem:[#allocation6 + $0xa0] sm:$0xff]  ;;  %v132_v31 = vld [vmem:[#allocation6 + $0x98] sm:$0xff]  ;;  %v68_v32 = vmul.f32 %v406_v29, %v66_v28  ;;  %v131_v34 = vld [vmem:[#allocation6 + $0x90] sm:$0xff] }
  0x19   :  { %93 = vmatpush.msra.mxu0 %v81_v6  ;;  %149 = vmatpush.msra.mxu1 %v141_v20  ;;  %v69_v33 = vld [vmem:[#allocation8 + $0x1] sm:$0x1]  ;;  %v130_v35 = vld [vmem:[#allocation6 + $0x88] sm:$0xff]  ;;  %v202_v39 = vld [vmem:[#allocation6 + $0x178] sm:$0xff] }
  0x1a   :  { %v70_v36 = vadd.f32 %v69_v33, %v68_v32  ;;  %v129_v37 = vld [vmem:[#allocation6 + $0x80] sm:$0xff]  ;;  %204 = vmatpush.msra.mxu2 %v202_v39  ;;  %v201_v56 = vld [vmem:[#allocation6 + $0x170] sm:$0xff]  ;;  %v200_v57 = vld [vmem:[#allocation6 + $0x168] sm:$0xff] }
  0x1b   :  { %94 = vmatpush.msra.mxu0 %v80_v7  ;;  %150 = vmatpush.msra.mxu1 %v140_v21  ;;  %v199_v58 = vld [vmem:[#allocation6 + $0x160] sm:$0xff]  ;;  %v198_v59 = vld [vmem:[#allocation6 + $0x158] sm:$0xff]  ;;  %v197_v60 = vld [vmem:[#allocation6 + $0x150] sm:$0xff] }
  0x1c   :  { %v87_v38 = vperm.slane %v70_v36, 0  ;;  %205 = vmatpush.msra.mxu2 %v201_v56  ;;  %v196_v61 = vld [vmem:[#allocation6 + $0x148] sm:$0xff]  ;;  %v195_v62 = vld [vmem:[#allocation6 + $0x140] sm:$0xff]  ;;  %v194_v63 = vld [vmem:[#allocation6 + $0x138] sm:$0xff] }
  0x1d   :  { %95 = vmatpush.msra.mxu0 %v79_v8  ;;  %151 = vmatpush.msra.mxu1 %v139_v22  ;;  %v193_v0 = vld [vmem:[#allocation6 + $0x130] sm:$0xff]  ;;  %v192_v1 = vld [vmem:[#allocation6 + $0x128] sm:$0xff]  ;;  %v124_v2 = vld [vmem:[#allocation8 + $0x2] sm:$0x1] }
  0x1e   :  { %206 = vmatpush.msra.mxu2 %v200_v57  ;;  %v191_v3 = vld [vmem:[#allocation6 + $0x120] sm:$0xff]  ;;  %v190_v4 = vld [vmem:[#allocation6 + $0x118] sm:$0xff]  ;;  %v125_v5 = vmul.f32 %v124_v2, %v406_v29  ;;  %v189_v7 = vld [vmem:[#allocation6 + $0x110] sm:$0xff] }
  0x1f   :  { %96 = vmatpush.msra.mxu0 %v78_v9  ;;  %152 = vmatpush.msra.mxu1 %v138_v23  ;;  %v126_v6 = vld [vmem:[#allocation8 + $0x3] sm:$0x1]  ;;  %v188_v8 = vld [vmem:[#allocation6 + $0x108] sm:$0xff]  ;;  %v182_v28 = vld [vmem:[#allocation8 + $0x4] sm:$0x1] }
  0x20   :  { %207 = vmatpush.msra.mxu2 %v199_v58  ;;  %v127_v9 = vadd.f32 %v126_v6, %v125_v5 }
  0x21   :  { %97 = vmatpush.msra.mxu0 %v77_v10  ;;  %153 = vmatpush.msra.mxu1 %v137_v24  ;;  %v187_v10 = vld [vmem:[#allocation6 + $0x100] sm:$0xff] }
  0x22   :  { %208 = vmatpush.msra.mxu2 %v198_v59 }
  0x23   :  { %98 = vmatpush.msra.mxu0 %v76_v11  ;;  %154 = vmatpush.msra.mxu1 %v136_v25  ;;  %v145_v11 = vperm.slane %v127_v9, 0 }
  0x24   :  { %209 = vmatpush.msra.mxu2 %v197_v60 }
  0x25   :  { %99 = vmatpush.msra.mxu0 %v75_v12  ;;  %155 = vmatpush.msra.mxu1 %v135_v26 }
  0x26   :  { %210 = vmatpush.msra.mxu2 %v196_v61 }
  0x27   :  { %100 = vmatpush.msra.mxu0 %v74_v13  ;;  %156 = vmatpush.msra.mxu1 %v134_v27 }
  0x28   :  { %211 = vmatpush.msra.mxu2 %v195_v62 }
  0x29   :  { %101 = vmatpush.msra.mxu0 %v73_v14  ;;  %157 = vmatpush.msra.mxu1 %v133_v30  ;;  %v183_v30 = vmul.f32 %v182_v28, %v406_v29 }
  0x2a   :  { %212 = vmatpush.msra.mxu2 %v194_v63 }
  0x2b   :  { %102 = vmatpush.msra.mxu0 %v72_v15  ;;  %158 = vmatpush.msra.mxu1 %v132_v31  ;;  %v184_v31 = vld [vmem:[#allocation8 + $0x5] sm:$0x1] }
  0x2c   :  { %213 = vmatpush.msra.mxu2 %v193_v0  ;;  %v185_v32 = vadd.f32 %v184_v31, %v183_v30 }
  0x2d   :  { %103 = vmatpush.msra.mxu0 %v71_v16  ;;  %159 = vmatpush.msra.mxu1 %v131_v34 }
  0x2e   :  { %104 = vmatmul.f32.vlgmr.msra.gmra.mxu0 %v65_v17  ;;  %214 = vmatpush.msra.mxu2 %v192_v1  ;;  %v203_v33 = vperm.slane %v185_v32, 0 }
  0x2f   :  { %160 = vmatpush.msra.mxu1 %v130_v35 }
  0x30   :  { %215 = vmatpush.msra.mxu2 %v191_v3 }
  0x31   :  { %161 = vmatpush.msra.mxu1 %v129_v37 }
  0x32   :  { %216 = vmatpush.msra.mxu2 %v190_v4 }
  0x34   :  { %217 = vmatpush.msra.mxu2 %v189_v7 }
  0x36   :  { %218 = vmatpush.msra.mxu2 %v188_v8 }
  0x38   :  { %219 = vmatpush.msra.mxu2 %v187_v10 }
  0xab   :  { %v105_v40 = vpop.f32.mrf.mxu0 }
  0xac   :  { %v106_v41 = vadd.f32 %v105_v40, %v87_v38 }
  0xae   :  { %v109_v42 = vand.u32 2147483647, %v106_v41  ;;  %v108_v53 = vmax.f32 %v106_v41, 0.0 }
  0xb0   :  { %v110_v43 = vsub.f32 0.0, %v109_v42 }
  0xb2   :  { %v111_v44 = vmul.f32 1.442695, %v110_v43 }
  0xb4   :  { %251 = vpow2.f32 %v111_v44 }
  0xba   :  { %v252_v45 = vpop.eup %251 }
  0xbb   :  { %v113_v46 = vadd.f32 1.0, %v252_v45  ;;  %v116_v47 = vmul.f32 -0.5, %v252_v45  ;;  %v119_v49 = vand.u32 2147483647, %v252_v45 }
  0xbd   :  { %253 = vlog2.f32 %v113_v46  ;;  %v117_v48 = vadd.f32 1.0, %v116_v47  ;;  %vm120_vm0 = vcmp.lt.f32.partialorder %v119_v49, 0.0004427343 }
  0xbf   :  { %v118_v52 = vmul.f32 %v252_v45, %v117_v48 }
  0xc3   :  { %v254_v50 = vpop.eup %253 }
  0xc4   :  { %v115_v51 = vmul.f32 0.6931472, %v254_v50 }
  0xc6   :  { %v121_v54 = vsel %vm120_vm0, %v118_v52, %v115_v51 }
  0xc7   :  { %v122_v55 = vadd.f32 %v121_v54, %v108_v53 }
  0xc9   :  { %162 = vmatmul.f32.vlgmr.msra.gmra.mxu1 %v122_v55 }
 0x146   :  { %v163_v12 = vpop.f32.mrf.mxu1 }
 0x147   :  { %v164_v13 = vadd.f32 %v163_v12, %v145_v11 }
 0x149   :  { %v167_v14 = vand.u32 2147483647, %v164_v13  ;;  %v166_v25 = vmax.f32 %v164_v13, 0.0 }
 0x14b   :  { %v168_v15 = vsub.f32 0.0, %v167_v14 }
 0x14d   :  { %v169_v16 = vmul.f32 1.442695, %v168_v15 }
 0x14f   :  { %255 = vpow2.f32 %v169_v16 }
 0x155   :  { %v256_v17 = vpop.eup %255 }
 0x156   :  { %v171_v18 = vadd.f32 1.0, %v256_v17  ;;  %v174_v19 = vmul.f32 -0.5, %v256_v17  ;;  %v177_v21 = vand.u32 2147483647, %v256_v17 }
 0x158   :  { %257 = vlog2.f32 %v171_v18  ;;  %v175_v20 = vadd.f32 1.0, %v174_v19  ;;  %vm178_vm1 = vcmp.lt.f32.partialorder %v177_v21, 0.0004427343 }
 0x15a   :  { %v176_v24 = vmul.f32 %v256_v17, %v175_v20 }
 0x15e   :  { %v258_v22 = vpop.eup %257 }
 0x15f   :  { %v173_v23 = vmul.f32 0.6931472, %v258_v22 }
 0x161   :  { %v179_v26 = vsel %vm178_vm1, %v176_v24, %v173_v23 }
 0x162   :  { %v180_v27 = vadd.f32 %v179_v26, %v166_v25 }
 0x164   :  { %220 = vmatmul.f32.vlgmr.msra.gmra.mxu2 %v180_v27 }
 0x1e7   :  { %v221_v34 = vpop.f32.mrf.mxu2 }
 0x1e8   :  { %v222_v35 = vadd.f32 %v221_v34, %v203_v33 }
 0x1ea   :  { %224 = vst [vmem:[#allocation9] sm:$0xff] %v222_v35 }
 0x1eb   :  { %235 = dma.vmem_to_hbm [thread:$0]  %s231_s7, 128, %s233_s10, [#allocation5]  }
 0x1ec   :  { %359 = dma.done.wait [#allocation5], 128  }
 0x1ed   :  { %360 = vsyncadd [#allocation5], 4294967168 }
 0x1ee   :  { %240 = vsyncpa [#allocation4], 1 }
 0x1ef   :  { %241 = vsyncpa [#allocation7], 1 }
 0x1f0   :  { %242 = vsyncpa [#allocation5], 1 }

</bundles_post_ra>
